<compile_context>
chip_gen: v5e
topology: v5e:2x2
jax: 0.10.0
libtpu: 0.0.40
codegen_flags: <defaults>
</compile_context>

<pallas_src>
import jax
import jax.numpy as jnp
from jax.experimental import pallas as pl
from jax.experimental.pallas import tpu as pltpu


# ---------------------------------------------------------------------------
# Kernel 1: fused 1x1 convolutions (conv_b | conv_c | conv_d) as one matmul.
# ---------------------------------------------------------------------------
def _proj_kernel(x_ref, w_ref, b_ref, fb_ref, fc_ref, fd_ref):
    c8 = fb_ref.shape[-1]
    # One lane-dense MXU matmul per x tile (weight already pre-transposed).
    f = jnp.dot(x_ref[...], w_ref[...], preferred_element_type=jnp.float32)
    f = f + b_ref[...]
    fb_ref[...] = f[:, :c8].astype(fb_ref.dtype)
    fc_ref[...] = f[:, c8:2 * c8].astype(fc_ref.dtype)
    fd_ref[...] = f[:, 2 * c8:].astype(fd_ref.dtype)


# ---------------------------------------------------------------------------
# Kernel 2: per-row softmax statistics.
#   Streams q-tiles (reduction axis, last) for each p-tile and keeps an online
#   (max, sum) in VMEM scratch.  S is computed transposed: rows = q, lanes = p,
#   so the per-p stats live in the lane dimension -> no transposes anywhere.
# ---------------------------------------------------------------------------
def _stats_kernel(fc_ref, fb_ref, m_ref, r_ref, m_s, l_s):
    qi = pl.program_id(2)

    @pl.when(qi == 0)
    def _():
        m_s[...] = jnp.full(m_s.shape, -jnp.inf, jnp.float32)
        l_s[...] = jnp.zeros(l_s.shape, jnp.float32)

    # S^T block (TQ, TP): contraction over the channel axis (last of both) --
    # bf16 operands, f32 accumulation, no explicit transpose.
    s_t = jax.lax.dot_general(
        fc_ref[...], fb_ref[...], (((1,), (1,)), ((), ())),
        preferred_element_type=jnp.float32)

    m_new = jnp.maximum(m_s[...], jnp.max(s_t, axis=0, keepdims=True))   # (1, TP)
    l_s[...] = (l_s[...] * jnp.exp(m_s[...] - m_new)
                + jnp.sum(jnp.exp(s_t - m_new), axis=0, keepdims=True))
    m_s[...] = m_new

    @pl.when(qi == pl.num_programs(2) - 1)
    def _():
        m_ref[...] = m_s[...]
        # Normalization factor 1/l computed once per row on the EUP.
        r_ref[...] = pl.reciprocal(l_s[...], approx=True)


# ---------------------------------------------------------------------------
# Kernel 3: E[q_tile] = sum_p softmax(S)[p, q_tile]^T @ Fd[p_tile], fused with
#   the residual alpha*E + x in the finalize.  p-tile axis is the (last,
#   "arbitrary") reduction axis; accumulator lives in VMEM f32 scratch.
# ---------------------------------------------------------------------------
def _accum_kernel(alpha_ref, x_ref, fc_ref, fb_ref, fd_ref, m_ref, r_ref,
                  o_ref, acc_ref):
    pj = pl.program_id(2)

    @pl.when(pj == 0)
    def _():
        acc_ref[...] = jnp.zeros(acc_ref.shape, jnp.float32)

    # Recompute the small S^T block (identical bf16 operands as in pass 1).
    s_t = jax.lax.dot_general(
        fc_ref[...], fb_ref[...], (((1,), (1,)), ((), ())),
        preferred_element_type=jnp.float32)                       # (TQ, TP)
    # Normalized probabilities for these rows; cast to bf16 for the MXU.
    a = (jnp.exp(s_t - m_ref[...]) * r_ref[...]).astype(fd_ref.dtype)
    # Standard (TQ,TP) @ (TP,C) matmul -- no transposed contraction needed.
    acc_ref[...] += jnp.dot(a, fd_ref[...], preferred_element_type=jnp.float32)

    @pl.when(pj == pl.num_programs(2) - 1)
    def _():
        alpha = alpha_ref[0]
        o_ref[...] = (alpha * acc_ref[...]
                      + x_ref[...].astype(jnp.float32)).astype(o_ref.dtype)


def _pick_tile(total, target):
    """Largest multiple of 16 that divides `total` and is <= target, else `total`."""
    t = min(target, total)
    if t >= total:
        return total
    t = (t // 16) * 16
    while t >= 16:
        if total % t == 0:
            return t
        t -= 16
    return total


def pam_forward(x_nchw, wb, bb, wc, bc, wd, bd, alpha,
                *, tile_q=512, tile_p=512, tile_r=512):
    """PAM forward.  x_nchw: (B, C, H, W); wb/wc: (C//8, C); wd: (C, C)."""
    B, C, H, W = x_nchw.shape
    assert C % 8 == 0, "PAM requires in_channels divisible by 8"
    P = H * W
    C8 = C // 8
    Cout = 2 * C8 + C
    f32, bf16 = jnp.float32, jnp.bfloat16
    dtype = x_nchw.dtype

    # NCHW -> (B, P, C) position-major (layout plumbing stays outside the kernels).
    x_pm = x_nchw.reshape(B, C, P).transpose(0, 2, 1).astype(f32)

    # Fuse + pre-transpose the three 1x1-conv weights: (C, C8 | C8 | C).
    w_fused = jnp.concatenate([wb, wc, wd], axis=0).T.astype(f32)       # (C, Cout)
    b_fused = jnp.concatenate([bb, bc, bd]).reshape(1, Cout).astype(f32)

    TQ = _pick_tile(P, tile_q)
    TP = _pick_tile(P, tile_p)
    TR = _pick_tile(P, tile_r)
    NQ, NP, NR = P // TQ, P // TP, P // TR

    # -------- pass 0: fused projections (stored bf16 for the MXU) --------
    fb, fc, fd = pl.pallas_call(
        _proj_kernel,
        out_shape=(jax.ShapeDtypeStruct((B, P, C8), bf16),
                   jax.ShapeDtypeStruct((B, P, C8), bf16),
                   jax.ShapeDtypeStruct((B, P, C), bf16)),
        grid=(B, NR),
        in_specs=[
            pl.BlockSpec((None, TR, C), lambda b, r: (b, r, 0)),
            pl.BlockSpec((C, Cout), lambda b, r: (0, 0)),
            pl.BlockSpec((1, Cout), lambda b, r: (0, 0)),
        ],
        out_specs=(
            pl.BlockSpec((None, TR, C8), lambda b, r: (b, r, 0)),
            pl.BlockSpec((None, TR, C8), lambda b, r: (b, r, 0)),
            pl.BlockSpec((None, TR, C), lambda b, r: (b, r, 0)),
        ),
        compiler_params=pltpu.CompilerParams(
            dimension_semantics=("parallel", "parallel")),
    )(x_pm, w_fused, b_fused)

    # -------- pass 1: per-row softmax stats m_p and r_p = 1/l_p --------
    # Stats are stored lane-major as (B, NP, TP) so both kernels use them
    # without any transposes and without 128-lane tiling constraints on TP.
    m_arr, r_arr = pl.pallas_call(
        _stats_kernel,
        out_shape=(jax.ShapeDtypeStruct((B, NP, TP), f32),
                   jax.ShapeDtypeStruct((B, NP, TP), f32)),
        grid=(B, NP, NQ),
        in_specs=[
            pl.BlockSpec((None, TQ, C8), lambda b, pj, qi: (b, qi, 0)),   # fc
            pl.BlockSpec((None, TP, C8), lambda b, pj, qi: (b, pj, 0)),   # fb
        ],
        out_specs=(
            pl.BlockSpec((None, 1, TP), lambda b, pj, qi: (b, pj, 0)),
            pl.BlockSpec((None, 1, TP), lambda b, pj, qi: (b, pj, 0)),
        ),
        scratch_shapes=[pltpu.VMEM((1, TP), f32), pltpu.VMEM((1, TP), f32)],
        compiler_params=pltpu.CompilerParams(
            dimension_semantics=("parallel", "parallel", "arbitrary")),
    )(fc, fb)

    # -------- pass 2: accumulate E over p-tiles, finalize alpha*E + x --------
    alpha_s = jnp.asarray(alpha, dtype=f32).reshape(1)
    out_pm = pl.pallas_call(
        _accum_kernel,
        out_shape=jax.ShapeDtypeStruct((B, P, C), dtype),
        grid=(B, NQ, NP),
        in_specs=[
            pl.BlockSpec(memory_space=pltpu.SMEM),                         # alpha
            pl.BlockSpec((None, TQ, C), lambda b, qi, pj: (b, qi, 0)),     # x (residual)
            pl.BlockSpec((None, TQ, C8), lambda b, qi, pj: (b, qi, 0)),    # fc
            pl.BlockSpec((None, TP, C8), lambda b, qi, pj: (b, pj, 0)),    # fb
            pl.BlockSpec((None, TP, C), lambda b, qi, pj: (b, pj, 0)),     # fd
            pl.BlockSpec((None, 1, TP), lambda b, qi, pj: (b, pj, 0)),     # m
            pl.BlockSpec((None, 1, TP), lambda b, qi, pj: (b, pj, 0)),     # r
        ],
        out_specs=pl.BlockSpec((None, TQ, C), lambda b, qi, pj: (b, qi, 0)),
        scratch_shapes=[pltpu.VMEM((TQ, C), f32)],
        compiler_params=pltpu.CompilerParams(
            dimension_semantics=("parallel", "parallel", "arbitrary")),
    )(alpha_s, x_pm, fc, fb, fd, m_arr, r_arr)

    # (B, P, C) -> NCHW
    return out_pm.transpose(0, 2, 1).reshape(B, C, H, W)


def pam_reference(x, wb, bb, wc, bc, wd, bd, alpha):
    """Pure-JAX reference mirroring the PyTorch forward exactly (f32)."""
    B, C, H, W = x.shape
    P = H * W

    def conv1x1(x, w, bias):
        return jnp.einsum('bchw,oc->bohw', x, w) + bias[None, :, None, None]

    fb = conv1x1(x, wb, bb).reshape(B, -1, P).transpose(0, 2, 1)      # (B, P, C8)
    fc = conv1x1(x, wc, bc).reshape(B, -1, P)                         # (B, C8, P)
    s = jax.nn.softmax(jnp.einsum('bpk,bkq->bpq', fb, fc), axis=-1)   # (B, P, P)
    fd = conv1x1(x, wd, bd).reshape(B, -1, P)                         # (B, C, P)
    e = jnp.einsum('bcp,bpq->bcq', fd, s).reshape(B, C, H, W)
    return alpha.reshape(()) * e + x


if __name__ == "__main__":
    # Small shapes consistent with PAM (in_channels must be divisible by 8).
    B, C, H, W = 2, 32, 8, 8
    C8 = C // 8

    key = jax.random.PRNGKey(0)
    kx, kwb, kbb, kwc, kbc, kwd, kbd = jax.random.split(key, 7)

    x = jax.random.normal(kx, (B, C, H, W), dtype=jnp.float32)
    wb = 0.1 * jax.random.normal(kwb, (C8, C), dtype=jnp.float32)   # conv_b 1x1 weight
    bb = 0.1 * jax.random.normal(kbb, (C8,), dtype=jnp.float32)
    wc = 0.1 * jax.random.normal(kwc, (C8, C), dtype=jnp.float32)   # conv_c 1x1 weight
    bc = 0.1 * jax.random.normal(kbc, (C8,), dtype=jnp.float32)
    wd = 0.1 * jax.random.normal(kwd, (C, C), dtype=jnp.float32)    # conv_d 1x1 weight
    bd = 0.1 * jax.random.normal(kbd, (C,), dtype=jnp.float32)
    # nn.Parameter(torch.zeros(1)) -> shape (1,); nonzero so attention contributes.
    alpha = jnp.array([0.5], dtype=jnp.float32)

    ref = pam_reference(x, wb, bb, wc, bc, wd, bd, alpha)

    # Small explicit tiles so the multi-tile online-softmax + p-accumulation
    # paths are exercised even at toy P = 64.
    out_tiled = pam_forward(x, wb, bb, wc, bc, wd, bd, alpha,
                            tile_q=32, tile_p=16, tile_r=32)
    out_tiled = jax.block_until_ready(out_tiled)
    assert out_tiled.shape == (B, C, H, W)
    assert jnp.allclose(out_tiled, ref, atol=1e-2, rtol=1e-2), "tiled mismatch vs reference"

    # Default tile sizes (single tile at this toy size).
    out_default = jax.block_until_ready(pam_forward(x, wb, bb, wc, bc, wd, bd, alpha))
    assert jnp.allclose(out_default, ref, atol=1e-2, rtol=1e-2), "default mismatch vs reference"

    print("KERNEL_OK")
</pallas_src>

<mosaic_0001>
module attributes {stable_mosaic.version = 11 : i64} {
  func.func @_proj_kernel(%arg0: i32, %arg1: i32, %arg2: memref<1x32x32xf32, #tpu.memory_space<vmem>>, %arg3: memref<32x40xf32, #tpu.memory_space<vmem>>, %arg4: memref<1x40xf32, #tpu.memory_space<vmem>>, %arg5: memref<1x32x4xbf16, #tpu.memory_space<vmem>>, %arg6: memref<1x32x4xbf16, #tpu.memory_space<vmem>>, %arg7: memref<1x32x32xbf16, #tpu.memory_space<vmem>>) attributes {dimension_semantics = [#tpu.dimension_semantics<parallel>, #tpu.dimension_semantics<parallel>], iteration_bounds = array<i64: 2, 2>, scalar_prefetch = 0 : i64, scratch_operands = 0 : i64, tpu.core_type = #tpu.core_type<tc>, window_params = [{transform_indices = @transform_0, window_bounds = array<i64: 1, 32, 32>}, {pipeline_mode = #tpu.pipeline_mode<synchronous>, transform_indices = @transform_1, window_bounds = array<i64: 32, 40>}, {pipeline_mode = #tpu.pipeline_mode<synchronous>, transform_indices = @transform_2, window_bounds = array<i64: 1, 40>}, {transform_indices = @transform_3, window_bounds = array<i64: 1, 32, 4>}, {transform_indices = @transform_4, window_bounds = array<i64: 1, 32, 4>}, {transform_indices = @transform_5, window_bounds = array<i64: 1, 32, 32>}]} {
    %c0 = arith.constant 0 : index
    %c0_0 = arith.constant 0 : index
    %c0_1 = arith.constant 0 : index
    %0 = vector.load %arg2[%c0, %c0_0, %c0_1] : memref<1x32x32xf32, #tpu.memory_space<vmem>>, vector<1x32x32xf32>
    %1 = vector.shape_cast %0 : vector<1x32x32xf32> to vector<32x32xf32>
    %c0_2 = arith.constant 0 : index
    %c0_3 = arith.constant 0 : index
    %2 = vector.load %arg3[%c0_2, %c0_3] : memref<32x40xf32, #tpu.memory_space<vmem>>, vector<32x40xf32>
    %cst = arith.constant dense<0.000000e+00> : vector<32x40xf32>
    %3 = tpu.matmul %1, %2, %cst {dimension_numbers = #tpu.dot_dimension_numbers<[1], [0], [0], [1], [0, 0, 1, 1], [], []>} : vector<32x32xf32>, vector<32x40xf32>, vector<32x40xf32> -> vector<32x40xf32>
    %c0_4 = arith.constant 0 : index
    %c0_5 = arith.constant 0 : index
    %4 = vector.load %arg4[%c0_4, %c0_5] : memref<1x40xf32, #tpu.memory_space<vmem>>, vector<1x40xf32>
    %5 = vector.broadcast %4 : vector<1x40xf32> to vector<32x40xf32>
    %6 = arith.addf %3, %5 : vector<32x40xf32>
    %7 = vector.extract_strided_slice %6 {offsets = [0, 0], sizes = [32, 4], strides = [1, 1]} : vector<32x40xf32> to vector<32x4xf32>
    %8 = arith.truncf %7 : vector<32x4xf32> to vector<32x4xbf16>
    %c0_6 = arith.constant 0 : index
    %c0_7 = arith.constant 0 : index
    %c0_8 = arith.constant 0 : index
    %9 = vector.load %arg5[%c0_6, %c0_7, %c0_8] : memref<1x32x4xbf16, #tpu.memory_space<vmem>>, vector<1x32x4xbf16>
    %10 = vector.shape_cast %9 : vector<1x32x4xbf16> to vector<32x4xbf16>
    %11 = vector.shape_cast %8 : vector<32x4xbf16> to vector<1x32x4xbf16>
    tpu.vector_store %arg5[%c0_6, %c0_7, %c0_8], %11 {strides = array<i32>} : memref<1x32x4xbf16, #tpu.memory_space<vmem>>, vector<1x32x4xbf16>,
    %12 = vector.extract_strided_slice %6 {offsets = [0, 4], sizes = [32, 4], strides = [1, 1]} : vector<32x40xf32> to vector<32x4xf32>
    %13 = arith.truncf %12 : vector<32x4xf32> to vector<32x4xbf16>
    %c0_9 = arith.constant 0 : index
    %c0_10 = arith.constant 0 : index
    %c0_11 = arith.constant 0 : index
    %14 = vector.load %arg6[%c0_9, %c0_10, %c0_11] : memref<1x32x4xbf16, #tpu.memory_space<vmem>>, vector<1x32x4xbf16>
    %15 = vector.shape_cast %14 : vector<1x32x4xbf16> to vector<32x4xbf16>
    %16 = vector.shape_cast %13 : vector<32x4xbf16> to vector<1x32x4xbf16>
    tpu.vector_store %arg6[%c0_9, %c0_10, %c0_11], %16 {strides = array<i32>} : memref<1x32x4xbf16, #tpu.memory_space<vmem>>, vector<1x32x4xbf16>,
    %17 = vector.extract_strided_slice %6 {offsets = [0, 8], sizes = [32, 32], strides = [1, 1]} : vector<32x40xf32> to vector<32x32xf32>
    %18 = arith.truncf %17 : vector<32x32xf32> to vector<32x32xbf16>
    %c0_12 = arith.constant 0 : index
    %c0_13 = arith.constant 0 : index
    %c0_14 = arith.constant 0 : index
    %19 = vector.load %arg7[%c0_12, %c0_13, %c0_14] : memref<1x32x32xbf16, #tpu.memory_space<vmem>>, vector<1x32x32xbf16>
    %20 = vector.shape_cast %19 : vector<1x32x32xbf16> to vector<32x32xbf16>
    %21 = vector.shape_cast %18 : vector<32x32xbf16> to vector<1x32x32xbf16>
    tpu.vector_store %arg7[%c0_12, %c0_13, %c0_14], %21 {strides = array<i32>} : memref<1x32x32xbf16, #tpu.memory_space<vmem>>, vector<1x32x32xbf16>,
    return
  }
  func.func @transform_0(%arg0: i32, %arg1: i32) -> (i32, i32, i32) {
    %c0_i32 = arith.constant 0 : i32
    %c0_i32_0 = arith.constant 0 : i32
    return %arg0, %arg1, %c0_i32 : i32, i32, i32
  }
  func.func @transform_1(%arg0: i32, %arg1: i32) -> (i32, i32) {
    %c0_i32 = arith.constant 0 : i32
    %c0_i32_0 = arith.constant 0 : i32
    %c0_i32_1 = arith.constant 0 : i32
    return %c0_i32, %c0_i32_0 : i32, i32
  }
  func.func @transform_2(%arg0: i32, %arg1: i32) -> (i32, i32) {
    %c0_i32 = arith.constant 0 : i32
    %c0_i32_0 = arith.constant 0 : i32
    %c0_i32_1 = arith.constant 0 : i32
    return %c0_i32, %c0_i32_0 : i32, i32
  }
  func.func @transform_3(%arg0: i32, %arg1: i32) -> (i32, i32, i32) {
    %c0_i32 = arith.constant 0 : i32
    %c0_i32_0 = arith.constant 0 : i32
    return %arg0, %arg1, %c0_i32 : i32, i32, i32
  }
  func.func @transform_4(%arg0: i32, %arg1: i32) -> (i32, i32, i32) {
    %c0_i32 = arith.constant 0 : i32
    %c0_i32_0 = arith.constant 0 : i32
    return %arg0, %arg1, %c0_i32 : i32, i32, i32
  }
  func.func @transform_5(%arg0: i32, %arg1: i32) -> (i32, i32, i32) {
    %c0_i32 = arith.constant 0 : i32
    %c0_i32_0 = arith.constant 0 : i32
    return %arg0, %arg1, %c0_i32 : i32, i32, i32
  }
}

</mosaic_0001>

<bundles_post_ra>
// kernel: tpu_custom_call.1
= control target key start
LH: loop header
LB: loop body
LE: loop exit
PB: predicated region body
PF: predicated region fallthrough
CT: control target
= control target key end

     0   :  { %s751_s18 = smov 0   ;;  %s753_s19 = smov 0   ;;  %s843_s0 = inlined_call_operand.vmem [shape: f32[2,64,32], index: 0, kind: input, shape index: {}]   ;;  %s844_s1 = inlined_call_operand.vmem [shape: f32[32,40], index: 1, kind: input, shape index: {}]   ;;  %s845_s2 = inlined_call_operand.vmem [shape: f32[1,40], index: 2, kind: input, shape index: {}]   ;;  %s846_s3 = inlined_call_operand.vmem [shape: bf16[2,64,4], index: 3, kind: output, shape index: {0}]   ;;  %s847_s4 = inlined_call_operand.vmem [shape: bf16[2,64,4], index: 4, kind: output, shape index: {1}]   ;;  %s848_s5 = inlined_call_operand.vmem [shape: bf16[2,64,32], index: 5, kind: output, shape index: {2}]  }
   0x1   :  { %s755_s20 = smov 0   ;;  %s757_s21 = smov 0  }
   0x2   :  { %s759_s22 = smov 0  }
   0x3 LB: > { %s25_s23 = sadd.s32 1, %s709_s20  ;;  %s28_s24 = sadd.s32 1, %s713_s21  ;;  %s717_s22 = sphi %s759_s22, %s16_s22   ;;  %s713_s21 = sphi %s757_s21, %s852_s21   ;;  %s709_s20 = sphi %s755_s20, %s851_s20   ;;  %s705_s19 = sphi %s753_s19, %s850_s19   ;;  %s701_s18 = sphi %s751_s18, %s849_s18  }
   0x4   : > { %p26_p0 = scmp.ge.s32.totalorder %s25_s23, 2  ;;  %p605_p1 = scmp.ge.s32.totalorder %s717_s22, 1 }
   0x5   : > { %p217_p2 = scmp.lt.s32.totalorder %s717_s22, 5 }
   0x6   : > { %s854_s23 = smov (%p26_p0, %s25_s23), 0  ;;  %s856_s24 = smov (!%p26_p0, %s28_s24), %s713_s21 }
   0x7   : > { %p218_p3 = pnand %p605_p1, %p217_p2  ;;  %p30_p4 = scmp.ge.s32.totalorder %s856_s24, 2 }
   0x8   : > { %s606_s29 = sshll.u32 (!%p218_p3), %s701_s18, 2  ;;  %p272_p5 = scmp.lt.s32.totalorder (!%p218_p3), %s705_s19, 1 }
   0x9   : > { %s858_s24 = smov (%p30_p4, %s856_s24), 0  ;;  %221 = sbr.rel (%p218_p3) target bundleno = 291 (0x123), region = 32 }
   0xa   : > { %p274_p6 = scmp.lt.s32.totalorder (!%p218_p3), %s606_s29, 7  ;;  %s719_s26 = smov (!%p218_p3), 124  }
   0xb   : > { %s720_s27 = smov (!%p218_p3), 120  }
   0xe   : > { %v318_v0 = vld [vmem:[%s844_s1 + $0x18] sm:$0xff]  ;;  %v317_v1 = vld [vmem:[%s844_s1 + $0x10] sm:$0xff]  ;;  %v316_v2 = vld [vmem:[%s844_s1 + $0x8] sm:$0xff]  ;;  %s860_s19 = smov (!%p272_p5, %s705_s19), 1  ;;  %s862_s29 = smov (!%p274_p6, %s606_s29), 7  ;;  %vm323_vm0 = vcmask 261120  }
   0xf   : > { %348 = vmatpush.msra.mxu0 %v318_v0  ;;  %625 = vmatpush.msra.mxu2 %v318_v0  ;;  %v315_v3 = vld [vmem:[%s844_s1] sm:$0xff]  ;;  %s607_s9 = sshll.u32 %s860_s19, 3  ;;  %vm369_vm1 = vcmask 27648   ;;  %vm406_vm2 = vcmask 257024  }
  0x10   : > { %624 = vmatpush.msra.mxu1 %v318_v0  ;;  %626 = vmatpush.msra.mxu3 %v318_v0  ;;  %s277_s10 = sadd.s32 %s607_s9, %s862_s29  ;;  %v678_v8 = vld [vmem:[%s845_s2] ss:$0 sm:$0xff] }
  0x11   : > { %349 = vmatpush.msra.mxu0 %v317_v1  ;;  %628 = vmatpush.msra.mxu2 %v317_v1  ;;  %s608_s11 = sshll.u32 %s277_s10, 3  ;;  %s802_s17 = sshll.u32 %s277_s10, 2 }
  0x12   : > { %627 = vmatpush.msra.mxu1 %v317_v1  ;;  %629 = vmatpush.msra.mxu3 %v317_v1  ;;  %s279_s14 = scalar_lea.vmem %s843_s0, %s608_s11  ;;  %s289_s25 = scalar_lea.vmem %s846_s3, %s802_s17 }
  0x13   : > { %350 = vmatpush.msra.mxu0 %v316_v2  ;;  %631 = vmatpush.msra.mxu2 %v316_v2  ;;  %v311_v4 = vld [vmem:[%s279_s14] sm:$0xff]  ;;  %v313_v5 = vld [vmem:[%s279_s14 + $0x10] sm:$0xff]  ;;  %v312_v6 = vld [vmem:[%s279_s14 + $0x8] sm:$0xff]  ;;  %s309_s30 = scalar_lea.vmem %s848_s5, %s802_s17  ;;  %s299_s8 = scalar_lea.vmem %s847_s4, %s802_s17 }
  0x14   : > { %630 = vmatpush.msra.mxu1 %v316_v2  ;;  %632 = vmatpush.msra.mxu3 %v316_v2  ;;  %v314_v7 = vld [vmem:[%s279_s14 + $0x18] sm:$0xff] }
  0x15   : > { %351 = vmatpush.msra.mxu0 %v315_v3  ;;  %634 = vmatpush.msra.mxu2 %v315_v3 }
  0x16   : > { %633 = vmatpush.msra.mxu1 %v315_v3  ;;  %635 = vmatpush.msra.mxu3 %v315_v3 }
  0x17   : > { %618 = vmatmul.msk.f32.vlgmr.msra.gmra.mxu0 %vm323_vm0, %v311_v4  ;;  %620 = vmatmul.msk.f32.vlgmr.msra.gmra.mxu2 %vm323_vm0, %v313_v5 }
  0x18   : > { %619 = vmatmul.msk.f32.vlgmr.msra.gmra.mxu1 %vm323_vm0, %v312_v6  ;;  %621 = vmatmul.msk.f32.vlgmr.msra.gmra.mxu3 %vm323_vm0, %v314_v7 }
  0x94   : > { %v353_v9 = vpop.f32.mrf.mxu0 }
  0x95   : > { %v354_v10 = vadd.f32 %v678_v8, %v353_v9  ;;  %v356_v11 = vpop.f32.mrf.mxu1 }
  0x96   : > { %v357_v12 = vadd.f32 %v678_v8, %v356_v11 }
  0x97   : > { %v365_v13 = vpack.c.bf16 %v354_v10, %v354_v10 }
  0x98   : > { %v366_v14 = vpack.c.bf16 %v357_v12, %v357_v12 }
  0x99   : > { %370 = vst.msk [vmem:[%s289_s25] sm:$0xf] %vm369_vm1, %v365_v13  ;;  %378 = vrot.lane.b32.xlu0 %v365_v13, %s719_s26  ;;  %394 = vrot.lane.b32.xlu2 %v365_v13, %s720_s27 }
  0x9a   : > { %v359_v15 = vpop.f32.mrf.mxu2  ;;  %371 = vst.msk [vmem:[%s289_s25 + $0x4] sm:$0xf] %vm369_vm1, %v366_v14 }
  0x9b   : > { %v360_v16 = vadd.f32 %v678_v8, %v359_v15  ;;  %v362_v17 = vpop.f32.mrf.mxu3 }
  0x9c   : > { %v363_v18 = vadd.f32 %v678_v8, %v362_v17 }
  0x9d   : > { %v367_v19 = vpack.c.bf16 %v360_v16, %v360_v16 }
  0x9e   : > { %v368_v20 = vpack.c.bf16 %v363_v18, %v363_v18 }
  0x9f   : > { %372 = vst.msk [vmem:[%s289_s25 + $0x8] sm:$0xf] %vm369_vm1, %v367_v19  ;;  %382 = vrot.lane.b32.xlu1 %v367_v19, %s719_s26 }
  0xa0   : > { %373 = vst.msk [vmem:[%s289_s25 + $0xc] sm:$0xf] %vm369_vm1, %v368_v20 }
  0xa1   : > { %380 = vrot.lane.b32.xlu0 %v366_v14, %s719_s26  ;;  %396 = vrot.lane.b32.xlu2 %v366_v14, %s720_s27 }
  0xa7   : > { %384 = vrot.lane.b32.xlu1 %v368_v20, %s719_s26 }
  0xa9   : > { %398 = vrot.lane.b32.xlu0 %v367_v19, %s720_s27 }
  0xaf   : > { %400 = vrot.lane.b32.xlu1 %v368_v20, %s720_s27 }
  0xf3   : > { %v395_v21 = vpop.permute.xlu2 %394 }
  0xf4   : > { %407 = vst.msk [vmem:[%s309_s30] sm:$0xf] %vm406_vm2, %v395_v21 }
  0xfb   : > { %v397_v22 = vpop.permute.xlu2 %396 }
  0xfc   : > { %408 = vst.msk [vmem:[%s309_s30 + $0x4] sm:$0xf] %vm406_vm2, %v397_v22 }
 0x10b   : > { %v379_v23 = vpop.permute.xlu0 %378 }
 0x10c   : > { %390 = vst.msk [vmem:[%s299_s8] sm:$0xf] %vm369_vm1, %v379_v23 }
 0x111   : > { %v383_v24 = vpop.permute.xlu1 %382 }
 0x112   : > { %392 = vst.msk [vmem:[%s299_s8 + $0x8] sm:$0xf] %vm369_vm1, %v383_v24 }
 0x113   : > { %v381_v25 = vpop.permute.xlu0 %380 }
 0x114   : > { %391 = vst.msk [vmem:[%s299_s8 + $0x4] sm:$0xf] %vm369_vm1, %v381_v25 }
 0x119   : > { %v385_v26 = vpop.permute.xlu1 %384 }
 0x11a   : > { %393 = vst.msk [vmem:[%s299_s8 + $0xc] sm:$0xf] %vm369_vm1, %v385_v26 }
 0x11b   : > { %v399_v27 = vpop.permute.xlu0 %398 }
 0x11c   : > { %409 = vst.msk [vmem:[%s309_s30 + $0x8] sm:$0xf] %vm406_vm2, %v399_v27 }
 0x121   : > { %v401_v28 = vpop.permute.xlu1 %400 }
 0x122   : > { %410 = vst.msk [vmem:[%s309_s30 + $0xc] sm:$0xf] %vm406_vm2, %v401_v28 }
 0x123 PF: > { %s16_s22 = sadd.s32 1, %s717_s22   ;;  %s849_s18 = smov %s709_s20 }
 0x124   : > { %p13_p7 = scmp.ge.s32.totalorder %s16_s22, 6   ;;  %s850_s19 = smov %s713_s21 }
 0x125   : > { %s851_s20 = smov %s854_s23  ;;  %s852_s21 = smov %s858_s24 }
 0x126   :  { %15 = sbr.rel (!%p13_p7) target bundleno = 3 (0x3), region = 86 }

</bundles_post_ra>
